<compile_context>
chip_gen: v7x
topology: tpu7x:2x2x1
jax: 0.10.0
libtpu: 0.0.40
codegen_flags: <defaults>
</compile_context>

<pallas_src>
import functools
import math

import numpy as np
import jax
import jax.numpy as jnp
from jax.experimental import pallas as pl
from jax.experimental.pallas import tpu as pltpu

# ---------------- problem sizes (n_head == d_head is required by the source code) ----
NQ = 8          # nq == nk
N_HEAD = 4
D_HEAD = 4      # must equal N_HEAD for torch.matmul(q, k) to be shape-legal
D_MODEL = N_HEAD * D_HEAD   # == d_all == 16


def _mha_kernel(x_ref, w_ref, o_ref, *, n_head, d_head, w2_off):
    """Single-shot kernel: everything resident in VMEM (tiny shapes)."""
    d_model = n_head * d_head          # 16
    dhD = d_head * d_model             # 64

    x = x_ref[...]                                                         # (N, D)

    # ---- MXU pass 1: fused [Q-replicated | K-tiled | (V @ fc^T * d_head)-tiled] projection.
    proj = jnp.dot(x, w_ref[:, 0:3 * dhD], preferred_element_type=jnp.float32)  # (N, 192)
    qrep = proj[:, 0 * dhD:1 * dhD]   # qrep [n, m*D + i*dh + j] = q[n,i,m] / sqrt(dh)
    ktile = proj[:, 1 * dhD:2 * dhD]  # ktile[n, m*D + i*dh + j] = k[n,m,j]
    vtile = proj[:, 2 * dhD:3 * dhD]  # vtile[n, l*D + i*dh + j] = dh * sum_m v[n,l,m]*wf[j,m]

    # Scores: full-lane-width FMAs, zero per-head lane extracts or (8,1) broadcasts.
    qk = qrep * ktile                                                      # (N, 64)
    a = qk[:, 0:d_model]
    for m in range(1, d_head):
        a = a + qk[:, m * d_model:(m + 1) * d_model]                       # (N, D)

    # Stable softmax numerator: a per-row max is constant within every d_head-lane
    # group, so it is a valid stabilizer and needs only one XLU row reduction.
    p = jnp.exp(a - jnp.max(a, axis=-1, keepdims=True))                    # (N, D)

    # ---- MXU pass 2: [p replicated per head | per-head group sums] in ONE dot.
    pp = jnp.dot(p, w_ref[:, w2_off:w2_off + dhD + d_model],
                 preferred_element_type=jnp.float32)                       # (N, 80)
    prep = pp[:, 0:dhD]               # prep [n, l*D + i*dh + j] = p[n, i*dh + l]
    denom = pp[:, dhD:dhD + d_model]  # denom[n, i*dh + j]       = sum_j' p[n, i*dh + j']

    pv = prep * vtile                                                      # (N, 64)
    out_num = pv[:, 0:d_model]
    for l in range(1, d_head):
        out_num = out_num + pv[:, l * d_model:(l + 1) * d_model]           # (N, D)

    # Softmax normalization via EUP approximate reciprocal (keeps the VALU slots free).
    o_ref[...] = (out_num * pl.reciprocal(denom, approx=True)).astype(o_ref.dtype)


def pack_weights(wq, wk, wv, wf, *, n_head):
    """Host-side, one-time weight packing (run ONCE, outside the hot path)."""
    wq, wk, wv, wf = (np.asarray(w, np.float32) for w in (wq, wk, wv, wf))
    D = wq.shape[0]
    dh = D // n_head
    H = n_head
    assert dh == H, "source code requires n_head == d_head"
    scale = np.float32(1.0 / math.sqrt(dh))

    # Q replicated across j, 1/sqrt(dh) folded in:  col m*D+i*dh+j <- row (m*H+i) of Wq
    A = (wq.T * scale).reshape(D, dh, H)                        # [t, m, i]
    w_qrep = np.broadcast_to(A[:, :, :, None], (D, dh, H, dh)).reshape(D, dh * D)

    # K tiled across heads i:  col m*D+i*dh+j <- row (j*H+m) of Wk
    B = wk.T.reshape(D, dh, H).transpose(0, 2, 1)               # [t, m, j]
    w_ktile = np.broadcast_to(B[:, :, None, :], (D, dh, H, dh)).reshape(D, dh * D)

    # V with fc (Linear(n_head, n_head), no bias) and the d_head scale folded in,
    # tiled across heads i:  col l*D+i*dh+j <- dh * sum_m Wv[m*H+l, :] * wf[j, m]
    C = wv.T.reshape(D, dh, H)                                  # [t, m, l]
    G = np.float32(dh) * np.einsum('tml,jm->tlj', C, wf)        # [t, l, j]
    w_vtile = np.broadcast_to(G[:, :, None, :], (D, dh, H, dh)).reshape(D, dh * D)

    w1 = np.concatenate([w_qrep, w_ktile, w_vtile], axis=1)     # (D, 192)

    # Second MXU pass operand: [per-head replication of p | per-head group-sum of p].
    eye_h = np.eye(H, dtype=np.float32)
    rep = np.concatenate(
        [np.kron(eye_h,
                 np.outer(np.eye(dh, dtype=np.float32)[l], np.ones(dh, np.float32)))
         for l in range(dh)], axis=1)                           # (D, dh*D) = (16, 64)
    grp = np.kron(eye_h, np.ones((dh, dh), np.float32))         # (D, D)    = (16, 16)
    w2 = np.concatenate([rep, grp], axis=1)                     # (16, 80)

    # One lane-tile-aligned VMEM slab: [ w1 | zero pad to 256 | w2 ] -> single weight DMA.
    w2_off = -(-w1.shape[1] // 128) * 128                       # 256
    packed = np.zeros((D, w2_off + w2.shape[1]), np.float32)
    packed[:, :w1.shape[1]] = w1
    packed[:, w2_off:] = w2
    return jnp.asarray(packed), int(w2_off)


@functools.partial(jax.jit, static_argnames=("n_head", "d_head", "w2_off"))
def mha_forward(x, w_packed, *, n_head, d_head, w2_off):
    # TODO(synk): if this module is ever invoked repeatedly (per layer / per token), add a
    # leading batch axis and a grid over it with dimension_semantics=("parallel",) to
    # amortize launch overhead and use both TensorCores on v7x; here a single (8, 16)
    # problem is launched grid-less, which is optimal for one call.
    kernel = functools.partial(_mha_kernel, n_head=n_head, d_head=d_head, w2_off=w2_off)
    vmem = pltpu.MemorySpace.VMEM
    return pl.pallas_call(
        kernel,
        out_shape=jax.ShapeDtypeStruct(x.shape, x.dtype),
        in_specs=[pl.BlockSpec(memory_space=vmem),    # x              (N, D)
                  pl.BlockSpec(memory_space=vmem)],   # packed weights (D, 336)
        out_specs=pl.BlockSpec(memory_space=vmem),
    )(x, w_packed)


def _reference(x, wq, wk, wv, wf, *, n_head=N_HEAD):
    """Pure-JAX mirror of the (reinterpreted) PyTorch forward, for validation."""
    N, D = x.shape
    dh = D // n_head
    q = (x @ wq.T).reshape(N, dh, n_head).transpose(0, 2, 1)
    k = (x @ wk.T).reshape(N, dh, n_head).transpose(0, 2, 1)
    v = (x @ wv.T).reshape(N, dh, n_head).transpose(0, 2, 1)
    a = jnp.einsum('nim,nmj->nij', q, k) / math.sqrt(dh)
    b = jax.nn.softmax(a, axis=-1)
    c = jnp.einsum('nim,nmj->nij', b, v)
    d = dh * c
    e = jnp.einsum('nim,jm->nij', d, wf)
    return e.reshape(N, D)


if __name__ == "__main__":
    key = jax.random.PRNGKey(0)
    kx, kq, kk, kv, kf = jax.random.split(key, 5)

    x = jax.random.normal(kx, (NQ, D_MODEL), dtype=jnp.float32)

    # Deterministic xavier-uniform-style init (matches the module's init in spirit).
    lim_d = math.sqrt(6.0 / (D_MODEL + D_MODEL))
    lim_h = math.sqrt(6.0 / (N_HEAD + N_HEAD))
    wq = jax.random.uniform(kq, (D_MODEL, D_MODEL), jnp.float32, -lim_d, lim_d)
    wk = jax.random.uniform(kk, (D_MODEL, D_MODEL), jnp.float32, -lim_d, lim_d)
    wv = jax.random.uniform(kv, (D_MODEL, D_MODEL), jnp.float32, -lim_d, lim_d)
    wf = jax.random.uniform(kf, (N_HEAD, N_HEAD), jnp.float32, -lim_h, lim_h)
    # NOTE: Model.fc (Linear(d_model, d_model) with bias) is dead code for the returned
    # value (`return attn`), so it is intentionally not materialized here.

    # One-time host-side packing (scales, fc and head re-layouts folded into the weights).
    w_packed, w2_off = pack_weights(wq, wk, wv, wf, n_head=N_HEAD)

    out = jax.block_until_ready(
        mha_forward(x, w_packed, n_head=N_HEAD, d_head=D_HEAD, w2_off=w2_off))
    ref = _reference(x, wq, wk, wv, wf)

    assert out.shape == (NQ, D_MODEL) and out.dtype == jnp.float32
    # Tolerance accommodates the EUP approximate reciprocal used for the softmax denominator.
    assert jnp.allclose(out, ref, atol=5e-3, rtol=5e-3), "mismatch vs JAX reference"
    print("KERNEL_OK")
</pallas_src>

<mosaic_0001>
module attributes {stable_mosaic.version = 11 : i64} {
  func.func @_mha_kernel(%arg0: memref<8x16xf32, #tpu.memory_space<vmem>>, %arg1: memref<16x336xf32, #tpu.memory_space<vmem>>, %arg2: memref<8x16xf32, #tpu.memory_space<vmem>>) attributes {dimension_semantics = [], scalar_prefetch = 0 : i64, scratch_operands = 0 : i64, tpu.core_type = #tpu.core_type<tc>} {
    %c0 = arith.constant 0 : index
    %c0_0 = arith.constant 0 : index
    %0 = vector.load %arg0[%c0, %c0_0] : memref<8x16xf32, #tpu.memory_space<vmem>>, vector<8x16xf32>
    %c0_1 = arith.constant 0 : index
    %c0_2 = arith.constant 0 : index
    %1 = vector.load %arg1[%c0_1, %c0_2] : memref<16x336xf32, #tpu.memory_space<vmem>>, vector<16x192xf32>
    %cst = arith.constant dense<0.000000e+00> : vector<8x192xf32>
    %2 = tpu.matmul %0, %1, %cst {dimension_numbers = #tpu.dot_dimension_numbers<[1], [0], [0], [1], [0, 0, 1, 1], [], []>} : vector<8x16xf32>, vector<16x192xf32>, vector<8x192xf32> -> vector<8x192xf32>
    %3 = vector.extract_strided_slice %2 {offsets = [0, 0], sizes = [8, 64], strides = [1, 1]} : vector<8x192xf32> to vector<8x64xf32>
    %4 = vector.extract_strided_slice %2 {offsets = [0, 64], sizes = [8, 64], strides = [1, 1]} : vector<8x192xf32> to vector<8x64xf32>
    %5 = vector.extract_strided_slice %2 {offsets = [0, 128], sizes = [8, 64], strides = [1, 1]} : vector<8x192xf32> to vector<8x64xf32>
    %6 = arith.mulf %3, %4 : vector<8x64xf32>
    %7 = vector.extract_strided_slice %6 {offsets = [0, 0], sizes = [8, 16], strides = [1, 1]} : vector<8x64xf32> to vector<8x16xf32>
    %8 = vector.extract_strided_slice %6 {offsets = [0, 16], sizes = [8, 16], strides = [1, 1]} : vector<8x64xf32> to vector<8x16xf32>
    %9 = arith.addf %7, %8 : vector<8x16xf32>
    %10 = vector.extract_strided_slice %6 {offsets = [0, 32], sizes = [8, 16], strides = [1, 1]} : vector<8x64xf32> to vector<8x16xf32>
    %11 = arith.addf %9, %10 : vector<8x16xf32>
    %12 = vector.extract_strided_slice %6 {offsets = [0, 48], sizes = [8, 16], strides = [1, 1]} : vector<8x64xf32> to vector<8x16xf32>
    %13 = arith.addf %11, %12 : vector<8x16xf32>
    %cst_3 = arith.constant dense<0xFF800000> : vector<8xf32>
    %14 = vector.multi_reduction <maximumf>, %13, %cst_3 [1] : vector<8x16xf32> to vector<8xf32>
    %15 = vector.shape_cast %14 : vector<8xf32> to vector<8x1xf32>
    %16 = vector.broadcast %15 : vector<8x1xf32> to vector<8x16xf32>
    %17 = arith.subf %13, %16 : vector<8x16xf32>
    %18 = math.exp %17 : vector<8x16xf32>
    %c0_4 = arith.constant 0 : index
    %c256 = arith.constant 256 : index
    %19 = vector.load %arg1[%c0_4, %c256] : memref<16x336xf32, #tpu.memory_space<vmem>>, vector<16x80xf32>
    %cst_5 = arith.constant dense<0.000000e+00> : vector<8x80xf32>
    %20 = tpu.matmul %18, %19, %cst_5 {dimension_numbers = #tpu.dot_dimension_numbers<[1], [0], [0], [1], [0, 0, 1, 1], [], []>} : vector<8x16xf32>, vector<16x80xf32>, vector<8x80xf32> -> vector<8x80xf32>
    %21 = vector.extract_strided_slice %20 {offsets = [0, 0], sizes = [8, 64], strides = [1, 1]} : vector<8x80xf32> to vector<8x64xf32>
    %22 = vector.extract_strided_slice %20 {offsets = [0, 64], sizes = [8, 16], strides = [1, 1]} : vector<8x80xf32> to vector<8x16xf32>
    %23 = arith.mulf %21, %5 : vector<8x64xf32>
    %24 = vector.extract_strided_slice %23 {offsets = [0, 0], sizes = [8, 16], strides = [1, 1]} : vector<8x64xf32> to vector<8x16xf32>
    %25 = vector.extract_strided_slice %23 {offsets = [0, 16], sizes = [8, 16], strides = [1, 1]} : vector<8x64xf32> to vector<8x16xf32>
    %26 = arith.addf %24, %25 : vector<8x16xf32>
    %27 = vector.extract_strided_slice %23 {offsets = [0, 32], sizes = [8, 16], strides = [1, 1]} : vector<8x64xf32> to vector<8x16xf32>
    %28 = arith.addf %26, %27 : vector<8x16xf32>
    %29 = vector.extract_strided_slice %23 {offsets = [0, 48], sizes = [8, 16], strides = [1, 1]} : vector<8x64xf32> to vector<8x16xf32>
    %30 = arith.addf %28, %29 : vector<8x16xf32>
    %31 = tpu.reciprocal %22 {approx = true} : vector<8x16xf32> -> vector<8x16xf32>
    %32 = arith.mulf %30, %31 : vector<8x16xf32>
    %c0_6 = arith.constant 0 : index
    %c0_7 = arith.constant 0 : index
    %33 = vector.load %arg2[%c0_6, %c0_7] : memref<8x16xf32, #tpu.memory_space<vmem>>, vector<8x16xf32>
    tpu.vector_store %arg2[%c0_6, %c0_7], %32 {strides = array<i32>} : memref<8x16xf32, #tpu.memory_space<vmem>>, vector<8x16xf32>,
    return
  }
}

</mosaic_0001>

<bundles_post_ra>
// kernel: mha_forward.1
= control target key start
LH: loop header
LB: loop body
LE: loop exit
PB: predicated region body
PF: predicated region fallthrough
CT: control target
= control target key end

     0   :  { %7 = vsyncpa [#allocation3], 0  ;;  %s441_s0 = inlined_call_operand.hbm [shape: f32[8,16], index: 0, kind: input, shape index: {}]   ;;  %s442_s1 = inlined_call_operand.hbm [shape: f32[16,336], index: 1, kind: input, shape index: {}]   ;;  %s443_s2 = inlined_call_operand.hbm [shape: f32[8,16], index: 2, kind: output, shape index: {}]  }
   0x1   :  { %8 = vsyncpa [#allocation6], 0 }
   0x2   :  { %9 = vsyncpa [#allocation4], 0  ;;  %s361_s9 = smov [#allocation2]   ;;  %s362_s11 = smov [#allocation5]  }
   0x3   :  { %s16_s10 = sshll.u32 %s361_s9, 4  ;;  %s25_s12 = sshll.u32 %s362_s11, 4  ;;  %s17_s10 = int_to_ptr.vmem [resolvable:$true] %s16_s10  ;;  %s388_s12 = int_to_ptr.vmem [resolvable:$true] %s25_s12 }
   0x4   :  { %s289_s15 = scalar_lea.hbm %s441_s0, 128 }
   0x5   :  { %p290_p0 = scmp.ne.s32.totalorder %s441_s0, %s289_s15  ;;  %p293_p1 = scmp.lt.u32.totalorder %s289_s15, %s441_s0 }
   0x7   :  { %p295_p2 = pnand %p293_p1, %p290_p0 }
   0x9   :  { %298 = shalt.err (!%p295_p2)
}
   0xa   :  { %s299_s20 = scalar_lea.vmem %s17_s10, 128  ;;  %p304_p4 = scmp.lt.s32.totalorder %s17_s10, %s17_s10 }
   0xb   :  { %p300_p3 = scmp.ne.s32.totalorder %s17_s10, %s299_s20  ;;  %p305_p5 = scmp.lt.s32.totalorder %s299_s20, %s299_s20 }
   0xd   :  { %p306_p6 = por %p305_p5, %p304_p4 }
   0xf   :  { %p307_p7 = pnand %p306_p6, %p300_p3 }
  0x11   :  { %310 = shalt.err (!%p307_p7)
}
  0x12   :  { %19 = dma.hbm_to_vmem [thread:$0]  %s441_s0, 128, %s17_s10, [#allocation3]  }
  0x13   :  { %s311_s25 = scalar_lea.hbm %s442_s1, 768 }
  0x14   :  { %p312_p8 = scmp.ne.s32.totalorder %s442_s1, %s311_s25  ;;  %p315_p9 = scmp.lt.u32.totalorder %s311_s25, %s442_s1 }
  0x16   :  { %p317_p10 = pnand %p315_p9, %p312_p8 }
  0x18   :  { %320 = shalt.err (!%p317_p10)
}
  0x19   :  { %s321_s30 = scalar_lea.vmem %s388_s12, 768  ;;  %p326_p12 = scmp.lt.s32.totalorder %s388_s12, %s388_s12 }
  0x1a   :  { %p322_p11 = scmp.ne.s32.totalorder %s388_s12, %s321_s30  ;;  %p327_p13 = scmp.lt.s32.totalorder %s321_s30, %s321_s30 }
  0x1c   :  { %p328_p0 = por %p327_p13, %p326_p12 }
  0x1e   :  { %p329_p1 = pnand %p328_p0, %p322_p11 }
  0x20   :  { %332 = shalt.err (!%p329_p1)
}
  0x21   :  { %s363_s0 = smov 384   ;;  %s364_s3 = smov 24  }
  0x22   :  { %31 = dma.hbm_to_vmem [thread:$0]  %s442_s1, 768, %s388_s12, [#allocation6], %s363_s0, %s363_s0, %s364_s3  }
  0x23   :  { %355 = dma.done.wait [#allocation3], 128  }
  0x24   :  { %356 = vsyncadd [#allocation3], 4294967168 }
  0x25   :  { %357 = dma.done.wait [#allocation6], 768  }
  0x26   :  { %358 = vsyncadd [#allocation6], 4294966528  ;;  %v365_v0 = vmov 0.0   ;;  %v40_v1 = vld [vmem:[#allocation5 + $0x8] sm:$0xff]  ;;  %v42_v2 = vld [vmem:[#allocation5 + $0x20] sm:$0xff]  ;;  %vm43_vm0 = vcmask 130048  }
  0x27   :  { %111 = vmatprep.mubr.f32.mxu0 %v365_v0  ;;  %v39_v3 = vld [vmem:[#allocation5] sm:$0xff]  ;;  %v266_v4 = vpack.c.bf16 %v42_v2, %v40_v1  ;;  %v41_v5 = vld [vmem:[#allocation5 + $0x18] sm:$0xff]  ;;  %s366_s1 = smov 64   ;;  %s367_s6 = smov 96   ;;  %v142_v19 = vld [vmem:[#allocation5 + $0x10] sm:$0xff]  ;;  %v370_v21 = vmov 0.0|0.0  }
  0x28   :  { %v268_v6 = vpack.c.bf16 %v41_v5, %v39_v3  ;;  %v38_v7 = vld [vmem:[#allocation2] sm:$0xff]  ;;  %s368_s7 = smov 112   ;;  %s369_s8 = smov 80   ;;  %v143_v20 = vld [vmem:[#allocation5 + $0x28] sm:$0xff]  ;;  %270 = vmatprep.subr.bf16.mxu1 %v370_v21  ;;  %vm371_vm1 = vmmov 0  }
  0x29   :  { %267 = vmatprep.subr.bf16.mxu0 %v266_v4  ;;  %v271_v22 = vpack.c.bf16 %v143_v20, %v142_v19  ;;  %263 = vmatprep.mubr.msk.f32.mxu1 %vm371_vm1, %v365_v0  ;;  %s372_s9 = smov [#allocation7]  }
  0x2a   :  { %269 = vmatpush1.bf16.msra.mxu0 %v268_v6  ;;  %s244_s10 = sshll.u32 %s372_s9, 4  ;;  %s245_s10 = int_to_ptr.vmem [resolvable:$true] %s244_s10 }
  0x2b   :  { %272 = vmatpush3.bf16.msra.mxu1 %v271_v22  ;;  %s333_s11 = scalar_lea.vmem %s245_s10, 128  ;;  %p338_p3 = scmp.lt.s32.totalorder %s245_s10, %s245_s10 }
  0x2c   :  { %p334_p2 = scmp.ne.s32.totalorder %s245_s10, %s333_s11  ;;  %p339_p4 = scmp.lt.s32.totalorder %s333_s11, %s333_s11 }
  0x2d   :  { %254 = vmatmul.mubr.msk.f32.vlgmr.msra.gmra.mrb[0].mxu0 %vm43_vm0, %v38_v7 }
  0x2e   :  { %p340_p5 = por %p339_p4, %p338_p3 }
  0x30   :  { %p341_p6 = pnand %p340_p5, %p334_p2 }
 0x100   :  { %v113_v8 = vpop.f32.mrb[0].mxu0 }
 0x101   :  { %119 = vrot.lane.b32.xlu0 %v113_v8, %s366_s1  ;;  %v115_v9 = vpop.f32.mrb[1].mxu0 }
 0x173   :  { %v120_v10 = vpop.permute.xlu0 %119 }
 0x174   :  { %v122_v11 = vmul.f32 %v120_v10, %v113_v8 }
 0x176   :  { %128 = vrot.lane.b32.xlu1 %v122_v11, %s367_s6  ;;  %124 = vrot.lane.b32.xlu0 %v122_v11, %s368_s7 }
 0x17a   :  { %132 = vrot.lane.b32.xlu1 %v122_v11, %s369_s8 }
 0x1e8   :  { %v129_v12 = vpop.permute.xlu1 %128  ;;  %v125_v13 = vpop.permute.xlu0 %124 }
 0x1e9   :  { %v127_v14 = vadd.f32 %v125_v13, %v122_v11 }
 0x1eb   :  { %v131_v15 = vadd.f32 %v129_v12, %v127_v14 }
 0x1ec   :  { %v133_v16 = vpop.permute.xlu1 %132 }
 0x1ed   :  { %v135_v17 = vadd.f32 %v133_v16, %v131_v15 }
 0x1ef   :  { %v136_v18 = vsel %vm43_vm0, %v135_v17, -inf }
 0x1f0   :  { %137 = vmax.xlane.f32.xlu0 %v136_v18 }
 0x27d   :  { %v138_v23 = vpop.xlane.xlu0 %137 }
 0x27e   :  { %v139_v24 = vsub.f32 %v135_v17, %v138_v23 }
 0x280   :  { %v140_v25 = vmul.f32 1.442695, %v139_v24 }
 0x282   :  { %285 = vpow2.f32 %v140_v25 }
 0x28c   :  { %v286_v26 = vpop.eup %285 }
 0x28d   :  { %264 = vmatmul.mubr.msk.f32.vlgmr.msra.gmra.mrb[0].mxu1 %vm43_vm0, %v286_v26 }
 0x360   :  { %v213_v27 = vpop.f32.mrb[0].mxu1 }
 0x361   :  { %v217_v28 = vmul.f32 %v213_v27, %v115_v9  ;;  %v265_v29 = vpop.f32.mrb[1].mxu1  ;;  %287 = vrcp.f32 %v213_v27 }
 0x363   :  { %219 = vrot.lane.b32.xlu1 %v217_v28, %s368_s7 }
 0x367   :  { %223 = vrot.lane.b32.xlu1 %v217_v28, %s367_s6 }
 0x36b   :  { %227 = vrot.lane.b32.xlu1 %v217_v28, %s369_s8  ;;  %v288_v30 = vpop.eup %287 }
 0x36f   :  { %233 = vrot.lane.b32.xlu1 %v288_v30, %s366_s1 }
 0x3d5   :  { %v220_v31 = vpop.permute.xlu1 %219 }
 0x3d6   :  { %v222_v33 = vadd.f32 %v220_v31, %v217_v28 }
 0x3d9   :  { %v224_v32 = vpop.permute.xlu1 %223 }
 0x3da   :  { %v226_v35 = vadd.f32 %v224_v32, %v222_v33 }
 0x3dd   :  { %v228_v34 = vpop.permute.xlu1 %227 }
 0x3de   :  { %v230_v36 = vadd.f32 %v228_v34, %v226_v35 }
 0x3e1   :  { %v234_v37 = vpop.permute.xlu1 %233 }
 0x3e2   :  { %v236_v38 = vmul.f32 %v234_v37, %v230_v36 }
 0x3e4   :  { %237 = vst.msk [vmem:[#allocation7] sm:$0xff] %vm43_vm0, %v236_v38 }
 0x3e5   :  { %344 = shalt.err (!%p341_p6)
}
 0x3e6   :  { %s345_s14 = scalar_lea.hbm %s443_s2, 128 }
 0x3e7   :  { %p346_p7 = scmp.ne.s32.totalorder %s443_s2, %s345_s14  ;;  %p349_p8 = scmp.lt.u32.totalorder %s345_s14, %s443_s2 }
 0x3e9   :  { %p351_p9 = pnand %p349_p8, %p346_p7 }
 0x3eb   :  { %354 = shalt.err (!%p351_p9)
}
 0x3ec   :  { %247 = dma.vmem_to_hbm [thread:$0]  %s245_s10, 128, %s443_s2, [#allocation4]  }
 0x3ed   :  { %359 = dma.done.wait [#allocation4], 128  }
 0x3ee   :  { %360 = vsyncadd [#allocation4], 4294967168 }
 0x3ef   :  { %251 = vsyncpa [#allocation3], 1 }
 0x3f0   :  { %252 = vsyncpa [#allocation6], 1 }
 0x3f1   :  { %253 = vsyncpa [#allocation4], 1 }

</bundles_post_ra>
